<compile_context>
chip_gen: v7x
topology: tpu7x:2x2x1
jax: 0.10.0
libtpu: 0.0.40
codegen_flags: <defaults>
</compile_context>

<pallas_src>
import functools

import jax
import jax.numpy as jnp
from jax.experimental import pallas as pl
from jax.experimental.pallas import tpu as pltpu

_LANE = 128
_MiB = 1 << 20

try:
    _VMEM_CAP = int(pltpu.get_tpu_info().vmem_capacity_bytes)
except Exception:  # unknown chip / emulator: assume the smallest (v7x per-TC, 64 MiB)
    _VMEM_CAP = 64 * _MiB

_TILE_BUDGET = _VMEM_CAP // 5          # per-step working-set budget (pipeline headroom)
_VMEM_LIMIT_CAP = (3 * _VMEM_CAP) // 4


def _pick_tile_s(S, C, itemsize):
    """Largest lane-dense spatial tile that divides S exactly (no pad/slice HBM
    round trip) and fits the per-step VMEM budget."""
    per_elem = C * (4 * itemsize + 4)  # 2 bufs x (x+out) + f32 intermediate, per lane
    cap = max(_LANE, _TILE_BUDGET // per_elem)
    if S <= cap:
        return S                       # whole spatial axis as one lane-dense block
    if S % _LANE == 0:
        best, t = _LANE, _LANE
        while t <= cap:
            if S % t == 0:
                best = t
            t += _LANE
        return best
    # TODO(synk): S not 128-aligned and too big for one block would need a masked
    # ragged last tile; fall back to a single full-axis block instead of padding.
    return S


def _pick_batch_block(N, n_s_tiles, C, tile_s, itemsize, min_steps=4):
    """Batch elements per grid step: amortizes per-step overhead in the small-S
    regime while keeping >= min_steps parallel steps (2 TCs on v7x)."""
    per_batch = C * tile_s * 4 * itemsize    # double-buffered x + out per batch elem
    bn = 1
    for cand in range(2, N + 1):
        if N % cand:
            continue
        if cand * per_batch + C * tile_s * 4 > _TILE_BUDGET:
            break
        if (N // cand) * n_s_tiles < min_steps:
            break
        bn = cand
    return bn


def _residual_conv1x1_kernel(x_ref, w_ref, b_ref, o_ref, *, bn, use_mxu):
    # x_ref/o_ref: (bn, C, TILE_S) tile — channels on sublanes, spatial on lanes.
    # w_ref: (C, C) conv weight with the identity (residual) already folded in.
    # b_ref: (C, 1) bias, broadcast over lanes.
    w = w_ref[...]
    b = b_ref[...].astype(jnp.float32)
    if not use_mxu:
        w = w.astype(jnp.float32)
    for i in range(bn):                        # static unroll over the batch block
        x = x_ref[i]
        if use_mxu:
            # 1x1 conv == matmul contracting over input channels; f32 accumulate.
            y = jnp.dot(w, x, preferred_element_type=jnp.float32) + b
        else:
            # Tiny-C path: C unrolled broadcast-FMA outer products on the VPU,
            # skipping MXU push/pop latency and sublane-padding waste.
            x32 = x.astype(jnp.float32)
            acc = w[:, 0:1] * x32[0:1, :]
            for c in range(1, w.shape[1]):
                acc = acc + w[:, c:c + 1] * x32[c:c + 1, :]
            y = acc + b
        o_ref[i] = y.astype(o_ref.dtype)


def residual_conv1x1(x_nchw, w_conv, b_conv):
    """y = Conv2d_1x1(x) + x, fused into a single HBM pass (read x, write y)."""
    N, C, H, W = x_nchw.shape
    c_out, c_in = w_conv.shape[0], w_conv.shape[1]
    assert c_out == c_in == C, "fused residual requires C_out == C_in == C"
    S = H * W
    itemsize = jnp.dtype(x_nchw.dtype).itemsize

    # Contiguous merge of the two minor dims: no transpose, no extra HBM traffic.
    x_flat = x_nchw.reshape(N, C, S)

    # Fold the residual into the weight (add in f32), then match x's dtype so the
    # matmul runs single-dtype (bf16 end-to-end when the model is bf16).
    w_mat = (w_conv.reshape(C, C).astype(jnp.float32)
             + jnp.eye(C, dtype=jnp.float32)).astype(x_nchw.dtype)
    b_col = b_conv.reshape(C, 1).astype(x_nchw.dtype)

    tile_s = _pick_tile_s(S, C, itemsize)
    n_s_tiles = S // tile_s
    bn = _pick_batch_block(N, n_s_tiles, C, tile_s, itemsize)

    # Scoped VMEM limit only when the double-buffered working set needs it
    # (v5e scoped default is 16 MiB, v6e/v7x 32 MiB).
    est = bn * C * tile_s * 4 * itemsize + C * tile_s * 4 + C * C * 4 + C * 4
    vmem_limit = None
    if est > 8 * _MiB:
        vmem_limit = int(min(max(2 * est, 32 * _MiB), _VMEM_LIMIT_CAP))

    kernel = functools.partial(_residual_conv1x1_kernel, bn=bn, use_mxu=(C > 8))

    out_flat = pl.pallas_call(
        kernel,
        out_shape=jax.ShapeDtypeStruct((N, C, S), x_nchw.dtype),
        grid_spec=pltpu.PrefetchScalarGridSpec(
            num_scalar_prefetch=0,
            grid=(N // bn, n_s_tiles),
            in_specs=[
                # x tile: bn batch rows, full channels (sublanes), lane-dense spatial
                pl.BlockSpec((bn, C, tile_s), lambda n, s: (n, 0, s)),
                # grid-invariant weight / bias stay resident in VMEM
                pl.BlockSpec((C, C), lambda n, s: (0, 0)),
                pl.BlockSpec((C, 1), lambda n, s: (0, 0)),
            ],
            out_specs=pl.BlockSpec((bn, C, tile_s), lambda n, s: (n, 0, s)),
        ),
        compiler_params=pltpu.CompilerParams(
            dimension_semantics=("parallel", "parallel"),
            vmem_limit_bytes=vmem_limit),
    )(x_flat, w_mat, b_col)

    return out_flat.reshape(N, C, H, W)


def _reference(x_nchw, w_conv, b_conv):
    C = w_conv.shape[0]
    y = jnp.einsum("nchw,oc->nohw", x_nchw, w_conv.reshape(C, C))
    return y + b_conv.reshape(1, -1, 1, 1) + x_nchw


if __name__ == "__main__":
    key = jax.random.PRNGKey(0)
    N, C, H, W = 2, 4, 16, 16
    kx, kw, kb = jax.random.split(key, 3)

    x = jax.random.normal(kx, (N, C, H, W), dtype=jnp.float32)
    w_conv = jax.random.normal(kw, (C, C, 1, 1), dtype=jnp.float32) * 0.1  # fn = Conv2d(C, C, 1)
    b_conv = jax.random.normal(kb, (C,), dtype=jnp.float32) * 0.1

    out = jax.block_until_ready(residual_conv1x1(x, w_conv, b_conv))

    ref = _reference(x, w_conv, b_conv)
    assert out.shape == (N, C, H, W)
    err = float(jnp.max(jnp.abs(out - ref)))
    assert jnp.allclose(out, ref, atol=1e-4, rtol=1e-4), err
    print("KERNEL_OK")
</pallas_src>

<mosaic_0001>
module attributes {stable_mosaic.version = 11 : i64} {
  func.func @_residual_conv1x1_kernel(%arg0: i32, %arg1: i32, %arg2: memref<1x4x256xf32, #tpu.memory_space<vmem>>, %arg3: memref<4x4xf32, #tpu.memory_space<vmem>>, %arg4: memref<4x1xf32, #tpu.memory_space<vmem>>, %arg5: memref<1x4x256xf32, #tpu.memory_space<vmem>>) attributes {dimension_semantics = [#tpu.dimension_semantics<parallel>, #tpu.dimension_semantics<parallel>], iteration_bounds = array<i64: 2, 1>, scalar_prefetch = 0 : i64, scratch_operands = 0 : i64, tpu.core_type = #tpu.core_type<tc>, window_params = [{transform_indices = @transform_0, window_bounds = array<i64: 1, 4, 256>}, {pipeline_mode = #tpu.pipeline_mode<synchronous>, transform_indices = @transform_1, window_bounds = array<i64: 4, 4>}, {pipeline_mode = #tpu.pipeline_mode<synchronous>, transform_indices = @transform_2, window_bounds = array<i64: 4, 1>}, {transform_indices = @transform_3, window_bounds = array<i64: 1, 4, 256>}]} {
    %c0 = arith.constant 0 : index
    %c0_0 = arith.constant 0 : index
    %0 = vector.load %arg3[%c0, %c0_0] : memref<4x4xf32, #tpu.memory_space<vmem>>, vector<4x4xf32>
    %c0_1 = arith.constant 0 : index
    %c0_2 = arith.constant 0 : index
    %1 = vector.load %arg4[%c0_1, %c0_2] : memref<4x1xf32, #tpu.memory_space<vmem>>, vector<4x1xf32>
    %c0_3 = arith.constant 0 : index
    %c0_4 = arith.constant 0 : index
    %c0_5 = arith.constant 0 : index
    %2 = vector.load %arg2[%c0_3, %c0_4, %c0_5] : memref<1x4x256xf32, #tpu.memory_space<vmem>>, vector<1x4x256xf32>
    %3 = vector.shape_cast %2 : vector<1x4x256xf32> to vector<4x256xf32>
    %4 = vector.extract_strided_slice %0 {offsets = [0, 0], sizes = [4, 1], strides = [1, 1]} : vector<4x4xf32> to vector<4x1xf32>
    %5 = vector.extract_strided_slice %3 {offsets = [0, 0], sizes = [1, 256], strides = [1, 1]} : vector<4x256xf32> to vector<1x256xf32>
    %6 = vector.broadcast %4 : vector<4x1xf32> to vector<4x256xf32>
    %7 = vector.broadcast %5 : vector<1x256xf32> to vector<4x256xf32>
    %8 = arith.mulf %6, %7 : vector<4x256xf32>
    %9 = vector.extract_strided_slice %0 {offsets = [0, 1], sizes = [4, 1], strides = [1, 1]} : vector<4x4xf32> to vector<4x1xf32>
    %10 = vector.extract_strided_slice %3 {offsets = [1, 0], sizes = [1, 256], strides = [1, 1]} : vector<4x256xf32> to vector<1x256xf32>
    %11 = vector.broadcast %9 : vector<4x1xf32> to vector<4x256xf32>
    %12 = vector.broadcast %10 : vector<1x256xf32> to vector<4x256xf32>
    %13 = arith.mulf %11, %12 : vector<4x256xf32>
    %14 = arith.addf %8, %13 : vector<4x256xf32>
    %15 = vector.extract_strided_slice %0 {offsets = [0, 2], sizes = [4, 1], strides = [1, 1]} : vector<4x4xf32> to vector<4x1xf32>
    %16 = vector.extract_strided_slice %3 {offsets = [2, 0], sizes = [1, 256], strides = [1, 1]} : vector<4x256xf32> to vector<1x256xf32>
    %17 = vector.broadcast %15 : vector<4x1xf32> to vector<4x256xf32>
    %18 = vector.broadcast %16 : vector<1x256xf32> to vector<4x256xf32>
    %19 = arith.mulf %17, %18 : vector<4x256xf32>
    %20 = arith.addf %14, %19 : vector<4x256xf32>
    %21 = vector.extract_strided_slice %0 {offsets = [0, 3], sizes = [4, 1], strides = [1, 1]} : vector<4x4xf32> to vector<4x1xf32>
    %22 = vector.extract_strided_slice %3 {offsets = [3, 0], sizes = [1, 256], strides = [1, 1]} : vector<4x256xf32> to vector<1x256xf32>
    %23 = vector.broadcast %21 : vector<4x1xf32> to vector<4x256xf32>
    %24 = vector.broadcast %22 : vector<1x256xf32> to vector<4x256xf32>
    %25 = arith.mulf %23, %24 : vector<4x256xf32>
    %26 = arith.addf %20, %25 : vector<4x256xf32>
    %27 = vector.broadcast %1 : vector<4x1xf32> to vector<4x256xf32>
    %28 = arith.addf %26, %27 : vector<4x256xf32>
    %c0_6 = arith.constant 0 : index
    %c0_7 = arith.constant 0 : index
    %c0_8 = arith.constant 0 : index
    %29 = vector.load %arg5[%c0_6, %c0_7, %c0_8] : memref<1x4x256xf32, #tpu.memory_space<vmem>>, vector<1x4x256xf32>
    %30 = vector.shape_cast %29 : vector<1x4x256xf32> to vector<4x256xf32>
    %31 = vector.shape_cast %28 : vector<4x256xf32> to vector<1x4x256xf32>
    tpu.vector_store %arg5[%c0_6, %c0_7, %c0_8], %31 {strides = array<i32>} : memref<1x4x256xf32, #tpu.memory_space<vmem>>, vector<1x4x256xf32>,
    return
  }
  func.func @transform_0(%arg0: i32, %arg1: i32) -> (i32, i32, i32) {
    %c0_i32 = arith.constant 0 : i32
    %c0_i32_0 = arith.constant 0 : i32
    return %arg0, %c0_i32, %arg1 : i32, i32, i32
  }
  func.func @transform_1(%arg0: i32, %arg1: i32) -> (i32, i32) {
    %c0_i32 = arith.constant 0 : i32
    %c0_i32_0 = arith.constant 0 : i32
    %c0_i32_1 = arith.constant 0 : i32
    return %c0_i32, %c0_i32_0 : i32, i32
  }
  func.func @transform_2(%arg0: i32, %arg1: i32) -> (i32, i32) {
    %c0_i32 = arith.constant 0 : i32
    %c0_i32_0 = arith.constant 0 : i32
    %c0_i32_1 = arith.constant 0 : i32
    return %c0_i32, %c0_i32_0 : i32, i32
  }
  func.func @transform_3(%arg0: i32, %arg1: i32) -> (i32, i32, i32) {
    %c0_i32 = arith.constant 0 : i32
    %c0_i32_0 = arith.constant 0 : i32
    return %arg0, %c0_i32, %arg1 : i32, i32, i32
  }
}

</mosaic_0001>

<bundles_post_ra>
// kernel: tpu_custom_call.1
= control target key start
LH: loop header
LB: loop body
LE: loop exit
PB: predicated region body
PF: predicated region fallthrough
CT: control target
= control target key end

     0   :  { %8 = vsyncpa [#allocation3], 0  ;;  %s838_s0 = inlined_call_operand.hbm [shape: f32[2,4,256], index: 0, kind: input, shape index: {}]   ;;  %s839_s1 = inlined_call_operand.vmem [shape: f32[4,4], index: 1, kind: input, shape index: {}]   ;;  %s840_s2 = inlined_call_operand.vmem [shape: f32[4,1], index: 2, kind: input, shape index: {}]   ;;  %s841_s3 = inlined_call_operand.hbm [shape: f32[2,4,256], index: 3, kind: output, shape index: {}]  }
   0x1   :  { %10 = vsyncpa [#allocation3 + $0x1], 0 }
   0x2   :  { %11 = vsyncpa [#allocation4], 0 }
   0x3   :  { %13 = vsyncpa [#allocation4 + $0x1], 0  ;;  %s656_s12 = smov 0   ;;  %s658_s13 = smov 0  }
   0x4   :  { %s660_s14 = smov 0   ;;  %s662_s15 = smov 0  }
   0x5   :  { %s664_s16 = smov 0   ;;  %s666_s17 = smov 0  }
   0x6 LB: > { %s427_s18 = sadd.s32 4294967295, %s628_s17   ;;  %s428_s19 = sadd.s32 4294967294, %s628_s17   ;;  %s628_s17 = sphi %s666_s17, %s19_s17   ;;  %s624_s16 = sphi %s664_s16, %s857_s16   ;;  %s620_s15 = sphi %s662_s15, %s856_s15   ;;  %s616_s14 = sphi %s660_s14, %s855_s14   ;;  %s612_s13 = sphi %s658_s13, %s854_s13   ;;  %s608_s12 = sphi %s656_s12, %s853_s12  }
   0x7   : > { %s31_s20 = sadd.s32 1, %s624_s16  ;;  %s40_s21 = sadd.s32 1, %s616_s14 }
   0x8   : > { %p33_p0 = scmp.ge.s32.totalorder %s31_s20, 2  ;;  %p47_p1 = scmp.ne.s32.totalorder %s616_s14, %s612_s13 }
   0x9   : > { %p48_p2 = scmp.eq.s32.totalorder %s628_s17, 0  ;;  %p53_p3 = scmp.ne.s32.totalorder %s612_s13, %s608_s12 }
   0xa   : > { %s859_s20 = smov (%p33_p0, %s31_s20), 0  ;;  %p54_p5 = scmp.eq.s32.totalorder %s427_s18, 0 }
   0xb   : > { %p697_p4 = por %p48_p2, %p47_p1  ;;  %s35_s23 = ssub.s32 %s624_s16, %s859_s20 }
   0xc   : > { %p121_p6 = scmp.eq.s32.totalorder %s427_s18, 1  ;;  %p38_p7 = scmp.eq.s32.totalorder %s35_s23, 0 }
   0xd   : > { %p703_p8 = por %p54_p5, %p53_p3  ;;  %p127_p10 = scmp.eq.s32.totalorder %s428_s19, 1 }
   0xe   : > { %p707_p9 = por %p121_p6, %p47_p1  ;;  %p456_p13 = scmp.lt.s32.totalorder %s628_s17, 2 }
   0xf   : > { %s712_s26 = scalar_select %p38_p7, %s616_s14, %s40_s21  }
  0x10   : > { %s845_s25 = scalar_select %p707_p9, 1, 0 }
  0x11   : > { %p714_p11 = por %p127_p10, %p53_p3  ;;  %s153_s28 = sand.u32 1, %s616_s14  }
  0x12   : > { %s431_s29 = sshll.u32 %s153_s28, 3  ;;  %s442_s30 = sshll.u32 %s624_s16, 7 }
  0x13   : > { %s846_s27 = scalar_select %p714_p11, 1, 0 }
  0x14   : > { %s725_s6 = scalar_lea.hbm %s838_s0, %s442_s30  ;;  %s157_s7 = scalar_lea.vmem [#allocation2], %s431_s29 }
  0x15   : > { %s167_s8 = sshll.u32 %s157_s7, 4  ;;  %p731_p0 = pnand %p456_p13, %p697_p4  ;;  %s727_s8 = int_to_ptr.vmem [resolvable:$true] %s167_s8 }
  0x16   : > { %s154_s10 = scalar_lea.sflag [#allocation3], %s153_s28  ;;  %s516_s11 = scalar_lea.hbm %s725_s6, 128 }
  0x17   : > { %p517_p3 = scmp.ne.s32.totalorder %s725_s6, %s516_s11  ;;  %p518_p5 = pneg %p731_p0 }
  0x18   : > { %s521_s21 = scalar_lea.hbm %s838_s0, 256  ;;  %p522_p4 = scmp.lt.u32.totalorder %s725_s6, %s838_s0 }
  0x19   : > { %p519_p6 = pnand %p518_p5, %p517_p3  ;;  %p523_p10 = scmp.lt.u32.totalorder %s521_s21, %s516_s11 }
  0x1a   : > { %p525_p12 = scmp.lt.u32.totalorder %s516_s11, %s725_s6 }
  0x1b   : > { %p520_p7 = pneg %p519_p6  ;;  %p524_p13 = por %p523_p10, %p522_p4 }
  0x1d   : > { %p526_p1 = por %p525_p12, %p524_p13 }
  0x1f   : > { %p527_p2 = pnand %p526_p1, %p520_p7 }
  0x21   : > { %530 = shalt.err (!%p527_p2)
}
  0x22   : > { %s531_s28 = scalar_lea.vmem %s727_s8, 128  ;;  %s630_s29 = smov [#allocation2]  }
  0x23   : > { %p532_p3 = scmp.ne.s32.totalorder %s727_s8, %s531_s28  ;;  %s536_s30 = sshll.u32 %s630_s29, 4  ;;  %s537_s30 = int_to_ptr.vmem [resolvable:$false] %s536_s30 }
  0x24   : > { %s538_s4 = scalar_lea.vmem %s537_s30, 256  ;;  %p539_p9 = scmp.lt.s32.totalorder %s727_s8, %s537_s30 }
  0x25   : > { %p534_p6 = pnand %p532_p3, %p518_p5  ;;  %p540_p4 = scmp.lt.s32.totalorder %s538_s4, %s531_s28 }
  0x27   : > { %p535_p11 = pneg %p534_p6  ;;  %p541_p10 = por %p540_p4, %p539_p9 }
  0x29   : > { %p542_p12 = pnand %p541_p10, %p535_p11 }
  0x2b   : > { %545 = shalt.err (!%p542_p12)
}
  0x2c   : > { %451 = dma.hbm_to_vmem [thread:$0]  (!%p731_p0), %s725_s6, 128, %s727_s8, %s154_s10  }
  0x2d   : > { %p848_p1 = scmp.lt.s32.totalorder %s628_s17, 3  ;;  %p849_p2 = scmp.ge.s32.totalorder %s628_s17, 1 }
  0x2f   : > { %p173_p5 = pnand %p849_p2, %p848_p1 }
  0x30   : > { %s767_s5 = sand.u32 (!%p173_p5), 1, %s612_s13  }
  0x31   : > { %176 = sbr.rel (%p173_p5) target bundleno = 218 (0xda), region = 32  ;;  %s435_s7 = sshll.u32 (!%p173_p5), %s767_s5, 3 }
  0x32   : > { %s179_s11 = scalar_lea.sflag (!%p173_p5), [#allocation3], %s767_s5  ;;  %s182_s9 = scalar_lea.vmem (!%p173_p5), [#allocation2], %s435_s7 }
  0x38   : > { %599 = dma.done.wait (%p703_p8), %s179_s11, 128  }
  0x39   : > { %601 = vsyncadd (%p703_p8), %s179_s11, 4294967168  ;;  %v631_v0 = vmov 0   ;;  %v632_v1 = vmov 2   ;;  %v207_v2 = vld [vmem:[%s839_s1] sm:$0xf]  ;;  %v633_v3 = vmov 1   ;;  %v216_v6 = vlaneseq }
  0x3a   : > { %510 = vset.pattern.permute.xlu0 %v631_v0  ;;  %512 = vset.pattern.permute.xlu1 %v632_v1  ;;  %v634_v4 = vmov 3   ;;  %v208_v5 = vld [vmem:[%s840_s2] sm:$0xf]  ;;  %s443_s24 = sshll.u32 %s620_s15, 7  ;;  %s204_s19 = scalar_lea.vmem [#allocation5], %s435_s7 }
  0x3b   : > { %212 = vperm.xlu0 %510, %v207_v2   ;;  %263 = vperm.xlu1 %512, %v207_v2   ;;  %v217_v7 = vshrl.u32 %v216_v6, 7  ;;  %v209_v12 = vld [vmem:[%s182_s9] sm:$0xff]  ;;  %s343_s21 = sshll.u32 %s204_s19, 4  ;;  %s789_s28 = scalar_lea.hbm %s841_s3, %s443_s24  ;;  %s791_s21 = int_to_ptr.vmem [resolvable:$true] %s343_s21 }
  0x3c   : > { %s327_s29 = scalar_lea.sflag [#allocation4], %s767_s5  ;;  %s546_s30 = scalar_lea.vmem %s791_s21, 128 }
  0x3d   : > { %v218_v8 = vsub.s32 0, %v217_v7  ;;  %v222_v9 = vsub.s32 4, %v217_v7  ;;  %v242_v10 = vsub.s32 1, %v217_v7  ;;  %v246_v11 = vsub.s32 5, %v217_v7  ;;  %p547_p8 = scmp.ne.s32.totalorder %s791_s21, %s546_s30  ;;  %p850_p9 = scmp.ne.s32.totalorder %s845_s25, 0 }
  0x3e   : > { %v268_v13 = vsub.s32 2, %v217_v7  ;;  %v272_v14 = vsub.s32 6, %v217_v7  ;;  %v294_v15 = vsub.s32 3, %v217_v7  ;;  %v298_v16 = vsub.s32 7, %v217_v7  ;;  %s635_s15 = smov [#allocation5]  }
  0x3f   : > { %511 = vset.pattern.permute.xlu0 %v633_v3  ;;  %513 = vset.pattern.permute.xlu1 %v634_v4  ;;  %v219_v17 = vrot.slane %v209_v12, %v218_v8  ;;  %v223_v18 = vrot.slane %v209_v12, %v222_v9  ;;  %v243_v19 = vrot.slane %v209_v12, %v242_v10  ;;  %p548_p11 = pnand %p547_p8, %p850_p9  ;;  %s550_s4 = sshll.u32 %s635_s15, 4  ;;  %s551_s4 = int_to_ptr.vmem [resolvable:$false] %s550_s4 }
  0x40   : > { %237 = vperm.xlu0 %511, %v207_v2   ;;  %289 = vperm.xlu1 %513, %v207_v2   ;;  %v247_v20 = vrot.slane %v209_v12, %v246_v11  ;;  %v269_v21 = vrot.slane %v209_v12, %v268_v13  ;;  %v273_v22 = vrot.slane %v209_v12, %v272_v14  ;;  %s552_s7 = scalar_lea.vmem %s551_s4, 256  ;;  %p553_p7 = scmp.lt.s32.totalorder %s791_s21, %s551_s4 }
  0x41   : > { %v295_v25 = vrot.slane %v209_v12, %v294_v15  ;;  %v299_v26 = vrot.slane %v209_v12, %v298_v16  ;;  %v229_v27 = vrot.slane %v219_v17, %v218_v8  ;;  %v233_v28 = vrot.slane %v223_v18, %v218_v8  ;;  %p549_p0 = pneg %p548_p11  ;;  %p554_p13 = scmp.lt.s32.totalorder %s552_s7, %s546_s30 }
  0x42   : > { %v253_v29 = vrot.slane %v243_v19, %v242_v10  ;;  %v257_v30 = vrot.slane %v247_v20, %v242_v10  ;;  %v279_v31 = vrot.slane %v269_v21, %v268_v13  ;;  %v283_v32 = vrot.slane %v273_v22, %v268_v13 }
  0x43   : > { %v305_v33 = vrot.slane %v295_v25, %v294_v15  ;;  %v309_v34 = vrot.slane %v299_v26, %v294_v15  ;;  %p555_p3 = por %p554_p13, %p553_p7 }
  0x44   : > { %514 = vset.pattern.permute.xlu1 %v631_v0  ;;  %515 = vset.pattern.permute.xlu0 %v631_v0 }
  0x45   : > { %316 = vperm.xlu1 %514, %v208_v5   ;;  %p556_p6 = pnand %p555_p3, %p549_p0 }
  0xba   : > { %v213_v23 = vpop.permute.xlu0 %212  ;;  %v264_v24 = vpop.permute.xlu1 %263 }
  0xbb   : > { %v234_v37 = vmul.f32 %v229_v27, %v213_v23  ;;  %v235_v38 = vmul.f32 %v233_v28, %v213_v23  ;;  %v284_v41 = vmul.f32 %v279_v31, %v264_v24  ;;  %v285_v42 = vmul.f32 %v283_v32, %v264_v24 }
  0xbf   : > { %v238_v35 = vpop.permute.xlu0 %237  ;;  %v290_v36 = vpop.permute.xlu1 %289 }
  0xc0   : > { %v258_v39 = vmul.f32 %v253_v29, %v238_v35  ;;  %v259_v40 = vmul.f32 %v257_v30, %v238_v35  ;;  %v310_v45 = vmul.f32 %v305_v33, %v290_v36  ;;  %v311_v46 = vmul.f32 %v309_v34, %v290_v36 }
  0xc2   : > { %v260_v43 = vadd.f32 %v258_v39, %v234_v37  ;;  %v261_v44 = vadd.f32 %v259_v40, %v235_v38 }
  0xc4   : > { %v286_v47 = vadd.f32 %v284_v41, %v260_v43  ;;  %v287_v48 = vadd.f32 %v285_v42, %v261_v44  ;;  %v317_v49 = vpop.permute.xlu1 %316 }
  0xc6   : > { %v312_v50 = vadd.f32 %v310_v45, %v286_v47  ;;  %v313_v51 = vadd.f32 %v311_v46, %v287_v48 }
  0xc8   : > { %v319_v52 = vadd.f32 %v317_v49, %v312_v50  ;;  %v320_v53 = vadd.f32 %v317_v49, %v313_v51 }
  0xca   : > { %v323_v54 = vcombine.low %v319_v52, %v320_v53 }
  0xcc   : > { %325 = vst [vmem:[%s204_s19] sm:$0xff] %v323_v54 }
  0xcd   : > { %559 = shalt.err (!%p556_p6)
}
  0xce   : > { %s560_s5 = scalar_lea.hbm %s789_s28, 128  ;;  %s564_s6 = scalar_lea.hbm %s841_s3, 256 }
  0xcf   : > { %p561_p4 = scmp.ne.s32.totalorder %s789_s28, %s560_s5  ;;  %p565_p1 = scmp.lt.u32.totalorder %s789_s28, %s841_s3 }
  0xd0   : > { %p566_p2 = scmp.lt.u32.totalorder %s564_s6, %s560_s5  ;;  %p568_p8 = scmp.lt.u32.totalorder %s560_s5, %s789_s28 }
  0xd1   : > { %p562_p10 = pnand %p561_p4, %p850_p9 }
  0xd2   : > { %p567_p5 = por %p566_p2, %p565_p1 }
  0xd3   : > { %p563_p12 = pneg %p562_p10 }
  0xd4   : > { %p569_p11 = por %p568_p8, %p567_p5 }
  0xd6   : > { %p570_p0 = pnand %p569_p11, %p563_p12 }
  0xd8   : > { %573 = shalt.err (!%p570_p0)
}
  0xd9   : > { %446 = dma.vmem_to_hbm [thread:$0]  (%p850_p9), %s791_s21, 128, %s789_s28, %s327_s29  }
  0xda PF: > { %s355_s18 = sand.u32 1, %s608_s12   ;;  %p851_p7 = scmp.ne.s32.totalorder %s846_s27, 0 }
  0xdb   : > { %p852_p13 = scmp.ge.s32.totalorder %s628_s17, 2  ;;  %s356_s24 = scalar_lea.sflag [#allocation4], %s355_s18 }
  0xdd   : > { %p453_p3 = pnand %p852_p13, %p851_p7 }
  0xdf   : > { %603 = dma.done.wait (!%p453_p3), %s356_s24, 128  }
  0xe0   : > { %605 = vsyncadd (!%p453_p3), %s356_s24, 4294967168  ;;  %s19_s17 = sadd.s32 1, %s628_s17   ;;  %s853_s12 = smov %s612_s13 }
  0xe1   : > { %p16_p6 = scmp.ge.s32.totalorder %s19_s17, 4   ;;  %s854_s13 = smov %s616_s14 }
  0xe2   : > { %s855_s14 = smov %s712_s26  ;;  %s856_s15 = smov %s624_s16 }
  0xe3   : > { %s857_s16 = smov %s859_s20  ;;  %18 = sbr.rel (!%p16_p6) target bundleno = 6 (0x6), region = 77 }
  0xea   :  { %361 = vsyncpa [#allocation3], 1 }
  0xeb   :  { %363 = vsyncpa [#allocation3 + $0x1], 1 }
  0xec   :  { %364 = vsyncpa [#allocation4], 1 }
  0xed   :  { %366 = vsyncpa [#allocation4 + $0x1], 1 }

</bundles_post_ra>
